<compile_context>
chip_gen: v7x
topology: tpu7x:2x2x1
jax: 0.10.0
libtpu: 0.0.40
codegen_flags: <defaults>
</compile_context>

<pallas_src>
import functools

import jax
import jax.numpy as jnp
import numpy as np
from jax import lax
from jax.experimental import pallas as pl
from jax.experimental.pallas import tpu as pltpu


# ----------------------------- fused kernel ------------------------------- #

def _fused_block_kernel(x_ref, lnw_ref, lnb_ref, w1_ref, b1_ref, w2_ref, b2_ref,
                        mask_ref, o_ref, *, hw, offsets, normalize):
    """One grid step == one batch sample.

    x_ref    : (C_in, HW)           sample activations (channels x flat spatial)
    lnw/lnb  : (C_in, HW)           LayerNorm affine params
    w1_ref   : (K*K, C_out, C_in)   conv1 weights, one (C_out, C_in) slab per tap
    w2_ref   : (K*K, C_out, C_out)  conv2 weights
    b1/b2    : (C_out, 1)
    mask_ref : (K*K, 1, HW)         1.0 where the tap reads a valid (non-pad) pixel
    o_ref    : (C_out, HW)
    """
    f32 = jnp.float32
    x = x_ref[...].astype(f32)                                    # (C, HW)
    masks = mask_ref[...].astype(f32)                             # (K*K, 1, HW), load once

    # ---- LayerNorm over (C, H, W) of this sample (biased var, eps=1e-5) ----
    if normalize:
        d = x.shape[0] * hw
        row_sum = jnp.sum(x, axis=1, keepdims=True)               # (C, 1)
        mean = jnp.sum(row_sum, axis=0, keepdims=True) / d        # (1, 1)
        xc = x - mean
        row_ss = jnp.sum(xc * xc, axis=1, keepdims=True)
        var = jnp.sum(row_ss, axis=0, keepdims=True) / d
        y = (xc * lax.rsqrt(var + 1e-5) * lnw_ref[...].astype(f32)
             + lnb_ref[...].astype(f32))
    else:
        y = x

    # ---- "same" KxK conv + SiLU as K*K shifted, masked matmuls ----
    def conv_silu(a, w_ref, b_ref):
        co = w_ref.shape[1]
        acc = jnp.zeros((co, hw), f32)
        for k, s in enumerate(offsets):
            sh = (-s) % hw                                        # non-negative static shift
            a_s = a if sh == 0 else pltpu.roll(a, shift=sh, axis=1)
            a_m = masks[k] * a_s                                  # zero invalid (padding) taps
            acc = acc + jnp.dot(w_ref[k].astype(f32), a_m,
                                preferred_element_type=f32)       # (Co, HW) on MXU
        pre = acc + b_ref[...].astype(f32)                        # (Co, 1) broadcast
        return pre * jax.nn.sigmoid(pre)                          # SiLU (EUP)

    h = conv_silu(y, w1_ref, b1_ref)                              # (Co, HW)
    out = conv_silu(h, w2_ref, b2_ref)                            # (Co, HW)
    o_ref[...] = out.astype(o_ref.dtype)


# ------------------------------- wrapper ----------------------------------- #

def block_forward(x, ln_w, ln_b, w1, b1, w2, b2, *, stride, padding, normalize):
    N, C, H, W = x.shape
    Co, Ci, K, K2 = w1.shape
    assert K == K2 and Ci == C
    # TODO(synk): general stride/padding would need an im2col path; this fused
    # kernel covers the module as used (kernel=3, stride=1, pad=1 -> 'same').
    assert stride == 1 and 2 * padding == K - 1, \
        "fused kernel supports stride=1 'same' convolutions"
    HW = H * W
    assert N == 1 or HW % 128 == 0, "H*W must be a multiple of 128 for lane blocking"

    # Layout prep (tiny, one-time): NCHW -> (C, N*H*W); weights -> per-tap slabs.
    x2d = jnp.transpose(x, (1, 0, 2, 3)).reshape(C, N * HW)
    lnw2d = ln_w.reshape(C, HW)
    lnb2d = ln_b.reshape(C, HW)
    w1r = jnp.transpose(w1, (2, 3, 0, 1)).reshape(K * K, Co, C)
    w2r = jnp.transpose(w2, (2, 3, 0, 1)).reshape(K * K, Co, Co)
    b1r = b1.reshape(Co, 1)
    b2r = b2.reshape(Co, 1)

    # Per-tap flat lane shift + validity mask (host constants).
    yy, xx = np.meshgrid(np.arange(H), np.arange(W), indexing="ij")
    offsets, mask_rows = [], []
    for ki in range(K):
        for kj in range(K):
            dy, dx = ki - padding, kj - padding
            offsets.append(int(dy * W + dx))
            valid = (yy + dy >= 0) & (yy + dy < H) & (xx + dx >= 0) & (xx + dx < W)
            mask_rows.append(valid.reshape(1, HW))
    masks = jnp.asarray(np.stack(mask_rows, 0), dtype=jnp.float32)   # (K*K, 1, HW)

    kernel = functools.partial(_fused_block_kernel, hw=HW,
                               offsets=tuple(offsets), normalize=normalize)

    out2d = pl.pallas_call(
        kernel,
        out_shape=jax.ShapeDtypeStruct((Co, N * HW), x.dtype),
        grid=(N,),
        in_specs=[
            pl.BlockSpec((C, HW), lambda n: (0, n)),              # x (per-sample lanes)
            pl.BlockSpec((C, HW), lambda n: (0, 0)),              # LN weight
            pl.BlockSpec((C, HW), lambda n: (0, 0)),              # LN bias
            pl.BlockSpec((K * K, Co, C), lambda n: (0, 0, 0)),    # conv1 weights
            pl.BlockSpec((Co, 1), lambda n: (0, 0)),              # conv1 bias
            pl.BlockSpec((K * K, Co, Co), lambda n: (0, 0, 0)),   # conv2 weights
            pl.BlockSpec((Co, 1), lambda n: (0, 0)),              # conv2 bias
            pl.BlockSpec((K * K, 1, HW), lambda n: (0, 0, 0)),    # tap masks
        ],
        out_specs=pl.BlockSpec((Co, HW), lambda n: (0, n)),
        compiler_params=pltpu.CompilerParams(
            dimension_semantics=("parallel",)),    # batch axis is independent
    )(x2d, lnw2d, lnb2d, w1r, b1r, w2r, b2r, masks)

    # (C_out, N*H*W) -> (N, C_out, H, W)
    return out2d.reshape(Co, N, H, W).transpose(1, 0, 2, 3)


# ----------------------------- reference (JAX) ----------------------------- #

def block_forward_ref(x, ln_w, ln_b, w1, b1, w2, b2, *, stride, padding, normalize):
    out = x
    if normalize:
        mean = jnp.mean(out, axis=(1, 2, 3), keepdims=True)
        var = jnp.mean(jnp.square(out - mean), axis=(1, 2, 3), keepdims=True)
        out = (out - mean) * lax.rsqrt(var + 1e-5)
        out = out * ln_w[None] + ln_b[None]
    for w, b in ((w1, b1), (w2, b2)):
        out = lax.conv_general_dilated(
            out, w, window_strides=(stride, stride),
            padding=((padding, padding), (padding, padding)),
            dimension_numbers=("NCHW", "OIHW", "NCHW"),
            precision=lax.Precision.HIGHEST)
        out = out + b[None, :, None, None]
        out = out * jax.nn.sigmoid(out)
    return out


# --------------------------------- main ------------------------------------ #

if __name__ == "__main__":
    # Block(shape=(C,H,W), in_channels=C, out_channels=Co, kernel_size=3,
    #       stride=1, padding=1, normalize=True)
    N, C, H, W = 2, 4, 16, 16
    Co, K, stride, pad = 8, 3, 1, 1
    normalize = True

    key = jax.random.PRNGKey(0)
    kx, kw1, kb1, kw2, kb2 = jax.random.split(key, 5)

    x = jax.random.normal(kx, (N, C, H, W), dtype=jnp.float32)

    # Deterministic parameter init (PyTorch-like scales).
    fan1 = C * K * K
    fan2 = Co * K * K
    ln_w = jnp.ones((C, H, W), jnp.float32)      # torch LayerNorm defaults
    ln_b = jnp.zeros((C, H, W), jnp.float32)
    w1 = jax.random.uniform(kw1, (Co, C, K, K), jnp.float32,
                            -1.0 / fan1 ** 0.5, 1.0 / fan1 ** 0.5)
    b1 = jax.random.uniform(kb1, (Co,), jnp.float32,
                            -1.0 / fan1 ** 0.5, 1.0 / fan1 ** 0.5)
    w2 = jax.random.uniform(kw2, (Co, Co, K, K), jnp.float32,
                            -1.0 / fan2 ** 0.5, 1.0 / fan2 ** 0.5)
    b2 = jax.random.uniform(kb2, (Co,), jnp.float32,
                            -1.0 / fan2 ** 0.5, 1.0 / fan2 ** 0.5)

    fwd = jax.jit(functools.partial(block_forward, stride=stride, padding=pad,
                                    normalize=normalize))
    out = jax.block_until_ready(fwd(x, ln_w, ln_b, w1, b1, w2, b2))

    ref = jax.block_until_ready(
        block_forward_ref(x, ln_w, ln_b, w1, b1, w2, b2,
                          stride=stride, padding=pad, normalize=normalize))

    assert out.shape == (N, Co, H, W), out.shape
    max_err = jnp.max(jnp.abs(out - ref))
    assert jnp.allclose(out, ref, rtol=2e-2, atol=5e-3), f"max abs err {max_err}"

    print("KERNEL_OK")
</pallas_src>

<mosaic_0001>
module attributes {stable_mosaic.version = 11 : i64} {
  func.func @_fused_block_kernel(%arg0: i32, %arg1: memref<4x256xf32, #tpu.memory_space<vmem>>, %arg2: memref<4x256xf32, #tpu.memory_space<vmem>>, %arg3: memref<4x256xf32, #tpu.memory_space<vmem>>, %arg4: memref<9x8x4xf32, #tpu.memory_space<vmem>>, %arg5: memref<8x1xf32, #tpu.memory_space<vmem>>, %arg6: memref<9x8x8xf32, #tpu.memory_space<vmem>>, %arg7: memref<8x1xf32, #tpu.memory_space<vmem>>, %arg8: memref<9x1x256xf32, #tpu.memory_space<vmem>>, %arg9: memref<8x256xf32, #tpu.memory_space<vmem>>) attributes {dimension_semantics = [#tpu.dimension_semantics<parallel>], iteration_bounds = array<i64: 2>, scalar_prefetch = 0 : i64, scratch_operands = 0 : i64, tpu.core_type = #tpu.core_type<tc>, window_params = [{transform_indices = @transform_0, window_bounds = array<i64: 4, 256>}, {pipeline_mode = #tpu.pipeline_mode<synchronous>, transform_indices = @transform_1, window_bounds = array<i64: 4, 256>}, {pipeline_mode = #tpu.pipeline_mode<synchronous>, transform_indices = @transform_2, window_bounds = array<i64: 4, 256>}, {pipeline_mode = #tpu.pipeline_mode<synchronous>, transform_indices = @transform_3, window_bounds = array<i64: 9, 8, 4>}, {pipeline_mode = #tpu.pipeline_mode<synchronous>, transform_indices = @transform_4, window_bounds = array<i64: 8, 1>}, {pipeline_mode = #tpu.pipeline_mode<synchronous>, transform_indices = @transform_5, window_bounds = array<i64: 9, 8, 8>}, {pipeline_mode = #tpu.pipeline_mode<synchronous>, transform_indices = @transform_6, window_bounds = array<i64: 8, 1>}, {pipeline_mode = #tpu.pipeline_mode<synchronous>, transform_indices = @transform_7, window_bounds = array<i64: 9, 1, 256>}, {transform_indices = @transform_8, window_bounds = array<i64: 8, 256>}]} {
    %c0 = arith.constant 0 : index
    %c0_0 = arith.constant 0 : index
    %0 = vector.load %arg1[%c0, %c0_0] : memref<4x256xf32, #tpu.memory_space<vmem>>, vector<4x256xf32>
    %c0_1 = arith.constant 0 : index
    %c0_2 = arith.constant 0 : index
    %c0_3 = arith.constant 0 : index
    %1 = vector.load %arg8[%c0_1, %c0_2, %c0_3] : memref<9x1x256xf32, #tpu.memory_space<vmem>>, vector<9x1x256xf32>
    %cst = arith.constant dense<0.000000e+00> : vector<4xf32>
    %2 = vector.multi_reduction <add>, %0, %cst [1] : vector<4x256xf32> to vector<4xf32>
    %3 = vector.shape_cast %2 : vector<4xf32> to vector<4x1xf32>
    %cst_4 = arith.constant dense<0.000000e+00> : vector<1xf32>
    %4 = vector.multi_reduction <add>, %3, %cst_4 [0] : vector<4x1xf32> to vector<1xf32>
    %5 = vector.shape_cast %4 : vector<1xf32> to vector<1x1xf32>
    %cst_5 = arith.constant 1.024000e+03 : f32
    %6 = vector.broadcast %cst_5 : f32 to vector<1x1xf32>
    %7 = arith.divf %5, %6 : vector<1x1xf32>
    %8 = vector.broadcast %7 : vector<1x1xf32> to vector<4x256xf32>
    %9 = arith.subf %0, %8 : vector<4x256xf32>
    %10 = arith.mulf %9, %9 : vector<4x256xf32>
    %cst_6 = arith.constant dense<0.000000e+00> : vector<4xf32>
    %11 = vector.multi_reduction <add>, %10, %cst_6 [1] : vector<4x256xf32> to vector<4xf32>
    %12 = vector.shape_cast %11 : vector<4xf32> to vector<4x1xf32>
    %cst_7 = arith.constant dense<0.000000e+00> : vector<1xf32>
    %13 = vector.multi_reduction <add>, %12, %cst_7 [0] : vector<4x1xf32> to vector<1xf32>
    %14 = vector.shape_cast %13 : vector<1xf32> to vector<1x1xf32>
    %cst_8 = arith.constant 1.024000e+03 : f32
    %15 = vector.broadcast %cst_8 : f32 to vector<1x1xf32>
    %16 = arith.divf %14, %15 : vector<1x1xf32>
    %cst_9 = arith.constant 9.99999974E-6 : f32
    %17 = vector.broadcast %cst_9 : f32 to vector<1x1xf32>
    %18 = arith.addf %16, %17 : vector<1x1xf32>
    %19 = math.rsqrt %18 : vector<1x1xf32>
    %20 = vector.broadcast %19 : vector<1x1xf32> to vector<4x256xf32>
    %21 = arith.mulf %9, %20 : vector<4x256xf32>
    %c0_10 = arith.constant 0 : index
    %c0_11 = arith.constant 0 : index
    %22 = vector.load %arg2[%c0_10, %c0_11] : memref<4x256xf32, #tpu.memory_space<vmem>>, vector<4x256xf32>
    %23 = arith.mulf %21, %22 : vector<4x256xf32>
    %c0_12 = arith.constant 0 : index
    %c0_13 = arith.constant 0 : index
    %24 = vector.load %arg3[%c0_12, %c0_13] : memref<4x256xf32, #tpu.memory_space<vmem>>, vector<4x256xf32>
    %25 = arith.addf %23, %24 : vector<4x256xf32>
    %cst_14 = arith.constant 0.000000e+00 : f32
    %26 = vector.broadcast %cst_14 : f32 to vector<8x256xf32>
    %c17_i32 = arith.constant 17 : i32
    %27 = tpu.dynamic_rotate %25 by %c17_i32 dim 1 : vector<4x256xf32>, i32 -> vector<4x256xf32>
    %28 = vector.extract_strided_slice %1 {offsets = [0, 0, 0], sizes = [1, 1, 256], strides = [1, 1, 1]} : vector<9x1x256xf32> to vector<1x1x256xf32>
    %29 = vector.shape_cast %28 : vector<1x1x256xf32> to vector<1x256xf32>
    %30 = vector.broadcast %29 : vector<1x256xf32> to vector<4x256xf32>
    %31 = arith.mulf %30, %27 : vector<4x256xf32>
    %c0_15 = arith.constant 0 : index
    %c0_16 = arith.constant 0 : index
    %c0_17 = arith.constant 0 : index
    %32 = vector.load %arg4[%c0_15, %c0_16, %c0_17] : memref<9x8x4xf32, #tpu.memory_space<vmem>>, vector<1x8x4xf32>
    %33 = vector.shape_cast %32 : vector<1x8x4xf32> to vector<8x4xf32>
    %cst_18 = arith.constant dense<0.000000e+00> : vector<8x256xf32>
    %34 = tpu.matmul %33, %31, %cst_18 {dimension_numbers = #tpu.dot_dimension_numbers<[1], [0], [0], [1], [0, 0, 1, 1], [], []>} : vector<8x4xf32>, vector<4x256xf32>, vector<8x256xf32> -> vector<8x256xf32>
    %35 = arith.addf %26, %34 : vector<8x256xf32>
    %c16_i32 = arith.constant 16 : i32
    %36 = tpu.dynamic_rotate %25 by %c16_i32 dim 1 : vector<4x256xf32>, i32 -> vector<4x256xf32>
    %37 = vector.extract_strided_slice %1 {offsets = [1, 0, 0], sizes = [1, 1, 256], strides = [1, 1, 1]} : vector<9x1x256xf32> to vector<1x1x256xf32>
    %38 = vector.shape_cast %37 : vector<1x1x256xf32> to vector<1x256xf32>
    %39 = vector.broadcast %38 : vector<1x256xf32> to vector<4x256xf32>
    %40 = arith.mulf %39, %36 : vector<4x256xf32>
    %c1 = arith.constant 1 : index
    %c0_19 = arith.constant 0 : index
    %c0_20 = arith.constant 0 : index
    %41 = vector.load %arg4[%c1, %c0_19, %c0_20] : memref<9x8x4xf32, #tpu.memory_space<vmem>>, vector<1x8x4xf32>
    %42 = vector.shape_cast %41 : vector<1x8x4xf32> to vector<8x4xf32>
    %cst_21 = arith.constant dense<0.000000e+00> : vector<8x256xf32>
    %43 = tpu.matmul %42, %40, %cst_21 {dimension_numbers = #tpu.dot_dimension_numbers<[1], [0], [0], [1], [0, 0, 1, 1], [], []>} : vector<8x4xf32>, vector<4x256xf32>, vector<8x256xf32> -> vector<8x256xf32>
    %44 = arith.addf %35, %43 : vector<8x256xf32>
    %c15_i32 = arith.constant 15 : i32
    %45 = tpu.dynamic_rotate %25 by %c15_i32 dim 1 : vector<4x256xf32>, i32 -> vector<4x256xf32>
    %46 = vector.extract_strided_slice %1 {offsets = [2, 0, 0], sizes = [1, 1, 256], strides = [1, 1, 1]} : vector<9x1x256xf32> to vector<1x1x256xf32>
    %47 = vector.shape_cast %46 : vector<1x1x256xf32> to vector<1x256xf32>
    %48 = vector.broadcast %47 : vector<1x256xf32> to vector<4x256xf32>
    %49 = arith.mulf %48, %45 : vector<4x256xf32>
    %c2 = arith.constant 2 : index
    %c0_22 = arith.constant 0 : index
    %c0_23 = arith.constant 0 : index
    %50 = vector.load %arg4[%c2, %c0_22, %c0_23] : memref<9x8x4xf32, #tpu.memory_space<vmem>>, vector<1x8x4xf32>
    %51 = vector.shape_cast %50 : vector<1x8x4xf32> to vector<8x4xf32>
    %cst_24 = arith.constant dense<0.000000e+00> : vector<8x256xf32>
    %52 = tpu.matmul %51, %49, %cst_24 {dimension_numbers = #tpu.dot_dimension_numbers<[1], [0], [0], [1], [0, 0, 1, 1], [], []>} : vector<8x4xf32>, vector<4x256xf32>, vector<8x256xf32> -> vector<8x256xf32>
    %53 = arith.addf %44, %52 : vector<8x256xf32>
    %c1_i32 = arith.constant 1 : i32
    %54 = tpu.dynamic_rotate %25 by %c1_i32 dim 1 : vector<4x256xf32>, i32 -> vector<4x256xf32>
    %55 = vector.extract_strided_slice %1 {offsets = [3, 0, 0], sizes = [1, 1, 256], strides = [1, 1, 1]} : vector<9x1x256xf32> to vector<1x1x256xf32>
    %56 = vector.shape_cast %55 : vector<1x1x256xf32> to vector<1x256xf32>
    %57 = vector.broadcast %56 : vector<1x256xf32> to vector<4x256xf32>
    %58 = arith.mulf %57, %54 : vector<4x256xf32>
    %c3 = arith.constant 3 : index
    %c0_25 = arith.constant 0 : index
    %c0_26 = arith.constant 0 : index
    %59 = vector.load %arg4[%c3, %c0_25, %c0_26] : memref<9x8x4xf32, #tpu.memory_space<vmem>>, vector<1x8x4xf32>
    %60 = vector.shape_cast %59 : vector<1x8x4xf32> to vector<8x4xf32>
    %cst_27 = arith.constant dense<0.000000e+00> : vector<8x256xf32>
    %61 = tpu.matmul %60, %58, %cst_27 {dimension_numbers = #tpu.dot_dimension_numbers<[1], [0], [0], [1], [0, 0, 1, 1], [], []>} : vector<8x4xf32>, vector<4x256xf32>, vector<8x256xf32> -> vector<8x256xf32>
    %62 = arith.addf %53, %61 : vector<8x256xf32>
    %63 = vector.extract_strided_slice %1 {offsets = [4, 0, 0], sizes = [1, 1, 256], strides = [1, 1, 1]} : vector<9x1x256xf32> to vector<1x1x256xf32>
    %64 = vector.shape_cast %63 : vector<1x1x256xf32> to vector<1x256xf32>
    %65 = vector.broadcast %64 : vector<1x256xf32> to vector<4x256xf32>
    %66 = arith.mulf %65, %25 : vector<4x256xf32>
    %c4 = arith.constant 4 : index
    %c0_28 = arith.constant 0 : index
    %c0_29 = arith.constant 0 : index
    %67 = vector.load %arg4[%c4, %c0_28, %c0_29] : memref<9x8x4xf32, #tpu.memory_space<vmem>>, vector<1x8x4xf32>
    %68 = vector.shape_cast %67 : vector<1x8x4xf32> to vector<8x4xf32>
    %cst_30 = arith.constant dense<0.000000e+00> : vector<8x256xf32>
    %69 = tpu.matmul %68, %66, %cst_30 {dimension_numbers = #tpu.dot_dimension_numbers<[1], [0], [0], [1], [0, 0, 1, 1], [], []>} : vector<8x4xf32>, vector<4x256xf32>, vector<8x256xf32> -> vector<8x256xf32>
    %70 = arith.addf %62, %69 : vector<8x256xf32>
    %c255_i32 = arith.constant 255 : i32
    %71 = tpu.dynamic_rotate %25 by %c255_i32 dim 1 : vector<4x256xf32>, i32 -> vector<4x256xf32>
    %72 = vector.extract_strided_slice %1 {offsets = [5, 0, 0], sizes = [1, 1, 256], strides = [1, 1, 1]} : vector<9x1x256xf32> to vector<1x1x256xf32>
    %73 = vector.shape_cast %72 : vector<1x1x256xf32> to vector<1x256xf32>
    %74 = vector.broadcast %73 : vector<1x256xf32> to vector<4x256xf32>
    %75 = arith.mulf %74, %71 : vector<4x256xf32>
    %c5 = arith.constant 5 : index
    %c0_31 = arith.constant 0 : index
    %c0_32 = arith.constant 0 : index
    %76 = vector.load %arg4[%c5, %c0_31, %c0_32] : memref<9x8x4xf32, #tpu.memory_space<vmem>>, vector<1x8x4xf32>
    %77 = vector.shape_cast %76 : vector<1x8x4xf32> to vector<8x4xf32>
    %cst_33 = arith.constant dense<0.000000e+00> : vector<8x256xf32>
    %78 = tpu.matmul %77, %75, %cst_33 {dimension_numbers = #tpu.dot_dimension_numbers<[1], [0], [0], [1], [0, 0, 1, 1], [], []>} : vector<8x4xf32>, vector<4x256xf32>, vector<8x256xf32> -> vector<8x256xf32>
    %79 = arith.addf %70, %78 : vector<8x256xf32>
    %c241_i32 = arith.constant 241 : i32
    %80 = tpu.dynamic_rotate %25 by %c241_i32 dim 1 : vector<4x256xf32>, i32 -> vector<4x256xf32>
    %81 = vector.extract_strided_slice %1 {offsets = [6, 0, 0], sizes = [1, 1, 256], strides = [1, 1, 1]} : vector<9x1x256xf32> to vector<1x1x256xf32>
    %82 = vector.shape_cast %81 : vector<1x1x256xf32> to vector<1x256xf32>
    %83 = vector.broadcast %82 : vector<1x256xf32> to vector<4x256xf32>
    %84 = arith.mulf %83, %80 : vector<4x256xf32>
    %c6 = arith.constant 6 : index
    %c0_34 = arith.constant 0 : index
    %c0_35 = arith.constant 0 : index
    %85 = vector.load %arg4[%c6, %c0_34, %c0_35] : memref<9x8x4xf32, #tpu.memory_space<vmem>>, vector<1x8x4xf32>
    %86 = vector.shape_cast %85 : vector<1x8x4xf32> to vector<8x4xf32>
    %cst_36 = arith.constant dense<0.000000e+00> : vector<8x256xf32>
    %87 = tpu.matmul %86, %84, %cst_36 {dimension_numbers = #tpu.dot_dimension_numbers<[1], [0], [0], [1], [0, 0, 1, 1], [], []>} : vector<8x4xf32>, vector<4x256xf32>, vector<8x256xf32> -> vector<8x256xf32>
    %88 = arith.addf %79, %87 : vector<8x256xf32>
    %c240_i32 = arith.constant 240 : i32
    %89 = tpu.dynamic_rotate %25 by %c240_i32 dim 1 : vector<4x256xf32>, i32 -> vector<4x256xf32>
    %90 = vector.extract_strided_slice %1 {offsets = [7, 0, 0], sizes = [1, 1, 256], strides = [1, 1, 1]} : vector<9x1x256xf32> to vector<1x1x256xf32>
    %91 = vector.shape_cast %90 : vector<1x1x256xf32> to vector<1x256xf32>
    %92 = vector.broadcast %91 : vector<1x256xf32> to vector<4x256xf32>
    %93 = arith.mulf %92, %89 : vector<4x256xf32>
    %c7 = arith.constant 7 : index
    %c0_37 = arith.constant 0 : index
    %c0_38 = arith.constant 0 : index
    %94 = vector.load %arg4[%c7, %c0_37, %c0_38] : memref<9x8x4xf32, #tpu.memory_space<vmem>>, vector<1x8x4xf32>
    %95 = vector.shape_cast %94 : vector<1x8x4xf32> to vector<8x4xf32>
    %cst_39 = arith.constant dense<0.000000e+00> : vector<8x256xf32>
    %96 = tpu.matmul %95, %93, %cst_39 {dimension_numbers = #tpu.dot_dimension_numbers<[1], [0], [0], [1], [0, 0, 1, 1], [], []>} : vector<8x4xf32>, vector<4x256xf32>, vector<8x256xf32> -> vector<8x256xf32>
    %97 = arith.addf %88, %96 : vector<8x256xf32>
    %c239_i32 = arith.constant 239 : i32
    %98 = tpu.dynamic_rotate %25 by %c239_i32 dim 1 : vector<4x256xf32>, i32 -> vector<4x256xf32>
    %99 = vector.extract_strided_slice %1 {offsets = [8, 0, 0], sizes = [1, 1, 256], strides = [1, 1, 1]} : vector<9x1x256xf32> to vector<1x1x256xf32>
    %100 = vector.shape_cast %99 : vector<1x1x256xf32> to vector<1x256xf32>
    %101 = vector.broadcast %100 : vector<1x256xf32> to vector<4x256xf32>
    %102 = arith.mulf %101, %98 : vector<4x256xf32>
    %c8 = arith.constant 8 : index
    %c0_40 = arith.constant 0 : index
    %c0_41 = arith.constant 0 : index
    %103 = vector.load %arg4[%c8, %c0_40, %c0_41] : memref<9x8x4xf32, #tpu.memory_space<vmem>>, vector<1x8x4xf32>
    %104 = vector.shape_cast %103 : vector<1x8x4xf32> to vector<8x4xf32>
    %cst_42 = arith.constant dense<0.000000e+00> : vector<8x256xf32>
    %105 = tpu.matmul %104, %102, %cst_42 {dimension_numbers = #tpu.dot_dimension_numbers<[1], [0], [0], [1], [0, 0, 1, 1], [], []>} : vector<8x4xf32>, vector<4x256xf32>, vector<8x256xf32> -> vector<8x256xf32>
    %106 = arith.addf %97, %105 : vector<8x256xf32>
    %c0_43 = arith.constant 0 : index
    %c0_44 = arith.constant 0 : index
    %107 = vector.load %arg5[%c0_43, %c0_44] : memref<8x1xf32, #tpu.memory_space<vmem>>, vector<8x1xf32>
    %108 = vector.broadcast %107 : vector<8x1xf32> to vector<8x256xf32>
    %109 = arith.addf %106, %108 : vector<8x256xf32>
    %110 = arith.negf %109 : vector<8x256xf32>
    %111 = math.exp %110 : vector<8x256xf32>
    %cst_45 = arith.constant 1.000000e+00 : f32
    %112 = vector.broadcast %cst_45 : f32 to vector<8x256xf32>
    %113 = arith.addf %112, %111 : vector<8x256xf32>
    %114 = arith.divf %112, %113 : vector<8x256xf32>
    %115 = arith.mulf %109, %114 : vector<8x256xf32>
    %cst_46 = arith.constant 0.000000e+00 : f32
    %116 = vector.broadcast %cst_46 : f32 to vector<8x256xf32>
    %c17_i32_47 = arith.constant 17 : i32
    %117 = tpu.dynamic_rotate %115 by %c17_i32_47 dim 1 : vector<8x256xf32>, i32 -> vector<8x256xf32>
    %118 = vector.extract_strided_slice %1 {offsets = [0, 0, 0], sizes = [1, 1, 256], strides = [1, 1, 1]} : vector<9x1x256xf32> to vector<1x1x256xf32>
    %119 = vector.shape_cast %118 : vector<1x1x256xf32> to vector<1x256xf32>
    %120 = vector.broadcast %119 : vector<1x256xf32> to vector<8x256xf32>
    %121 = arith.mulf %120, %117 : vector<8x256xf32>
    %c0_48 = arith.constant 0 : index
    %c0_49 = arith.constant 0 : index
    %c0_50 = arith.constant 0 : index
    %122 = vector.load %arg6[%c0_48, %c0_49, %c0_50] : memref<9x8x8xf32, #tpu.memory_space<vmem>>, vector<1x8x8xf32>
    %123 = vector.shape_cast %122 : vector<1x8x8xf32> to vector<8x8xf32>
    %cst_51 = arith.constant dense<0.000000e+00> : vector<8x256xf32>
    %124 = tpu.matmul %123, %121, %cst_51 {dimension_numbers = #tpu.dot_dimension_numbers<[1], [0], [0], [1], [0, 0, 1, 1], [], []>} : vector<8x8xf32>, vector<8x256xf32>, vector<8x256xf32> -> vector<8x256xf32>
    %125 = arith.addf %116, %124 : vector<8x256xf32>
    %c16_i32_52 = arith.constant 16 : i32
    %126 = tpu.dynamic_rotate %115 by %c16_i32_52 dim 1 : vector<8x256xf32>, i32 -> vector<8x256xf32>
    %127 = vector.extract_strided_slice %1 {offsets = [1, 0, 0], sizes = [1, 1, 256], strides = [1, 1, 1]} : vector<9x1x256xf32> to vector<1x1x256xf32>
    %128 = vector.shape_cast %127 : vector<1x1x256xf32> to vector<1x256xf32>
    %129 = vector.broadcast %128 : vector<1x256xf32> to vector<8x256xf32>
    %130 = arith.mulf %129, %126 : vector<8x256xf32>
    %c1_53 = arith.constant 1 : index
    %c0_54 = arith.constant 0 : index
    %c0_55 = arith.constant 0 : index
    %131 = vector.load %arg6[%c1_53, %c0_54, %c0_55] : memref<9x8x8xf32, #tpu.memory_space<vmem>>, vector<1x8x8xf32>
    %132 = vector.shape_cast %131 : vector<1x8x8xf32> to vector<8x8xf32>
    %cst_56 = arith.constant dense<0.000000e+00> : vector<8x256xf32>
    %133 = tpu.matmul %132, %130, %cst_56 {dimension_numbers = #tpu.dot_dimension_numbers<[1], [0], [0], [1], [0, 0, 1, 1], [], []>} : vector<8x8xf32>, vector<8x256xf32>, vector<8x256xf32> -> vector<8x256xf32>
    %134 = arith.addf %125, %133 : vector<8x256xf32>
    %c15_i32_57 = arith.constant 15 : i32
    %135 = tpu.dynamic_rotate %115 by %c15_i32_57 dim 1 : vector<8x256xf32>, i32 -> vector<8x256xf32>
    %136 = vector.extract_strided_slice %1 {offsets = [2, 0, 0], sizes = [1, 1, 256], strides = [1, 1, 1]} : vector<9x1x256xf32> to vector<1x1x256xf32>
    %137 = vector.shape_cast %136 : vector<1x1x256xf32> to vector<1x256xf32>
    %138 = vector.broadcast %137 : vector<1x256xf32> to vector<8x256xf32>
    %139 = arith.mulf %138, %135 : vector<8x256xf32>
    %c2_58 = arith.constant 2 : index
    %c0_59 = arith.constant 0 : index
    %c0_60 = arith.constant 0 : index
    %140 = vector.load %arg6[%c2_58, %c0_59, %c0_60] : memref<9x8x8xf32, #tpu.memory_space<vmem>>, vector<1x8x8xf32>
    %141 = vector.shape_cast %140 : vector<1x8x8xf32> to vector<8x8xf32>
    %cst_61 = arith.constant dense<0.000000e+00> : vector<8x256xf32>
    %142 = tpu.matmul %141, %139, %cst_61 {dimension_numbers = #tpu.dot_dimension_numbers<[1], [0], [0], [1], [0, 0, 1, 1], [], []>} : vector<8x8xf32>, vector<8x256xf32>, vector<8x256xf32> -> vector<8x256xf32>
    %143 = arith.addf %134, %142 : vector<8x256xf32>
    %c1_i32_62 = arith.constant 1 : i32
    %144 = tpu.dynamic_rotate %115 by %c1_i32_62 dim 1 : vector<8x256xf32>, i32 -> vector<8x256xf32>
    %145 = vector.extract_strided_slice %1 {offsets = [3, 0, 0], sizes = [1, 1, 256], strides = [1, 1, 1]} : vector<9x1x256xf32> to vector<1x1x256xf32>
    %146 = vector.shape_cast %145 : vector<1x1x256xf32> to vector<1x256xf32>
    %147 = vector.broadcast %146 : vector<1x256xf32> to vector<8x256xf32>
    %148 = arith.mulf %147, %144 : vector<8x256xf32>
    %c3_63 = arith.constant 3 : index
    %c0_64 = arith.constant 0 : index
    %c0_65 = arith.constant 0 : index
    %149 = vector.load %arg6[%c3_63, %c0_64, %c0_65] : memref<9x8x8xf32, #tpu.memory_space<vmem>>, vector<1x8x8xf32>
    %150 = vector.shape_cast %149 : vector<1x8x8xf32> to vector<8x8xf32>
    %cst_66 = arith.constant dense<0.000000e+00> : vector<8x256xf32>
    %151 = tpu.matmul %150, %148, %cst_66 {dimension_numbers = #tpu.dot_dimension_numbers<[1], [0], [0], [1], [0, 0, 1, 1], [], []>} : vector<8x8xf32>, vector<8x256xf32>, vector<8x256xf32> -> vector<8x256xf32>
    %152 = arith.addf %143, %151 : vector<8x256xf32>
    %153 = vector.extract_strided_slice %1 {offsets = [4, 0, 0], sizes = [1, 1, 256], strides = [1, 1, 1]} : vector<9x1x256xf32> to vector<1x1x256xf32>
    %154 = vector.shape_cast %153 : vector<1x1x256xf32> to vector<1x256xf32>
    %155 = vector.broadcast %154 : vector<1x256xf32> to vector<8x256xf32>
    %156 = arith.mulf %155, %115 : vector<8x256xf32>
    %c4_67 = arith.constant 4 : index
    %c0_68 = arith.constant 0 : index
    %c0_69 = arith.constant 0 : index
    %157 = vector.load %arg6[%c4_67, %c0_68, %c0_69] : memref<9x8x8xf32, #tpu.memory_space<vmem>>, vector<1x8x8xf32>
    %158 = vector.shape_cast %157 : vector<1x8x8xf32> to vector<8x8xf32>
    %cst_70 = arith.constant dense<0.000000e+00> : vector<8x256xf32>
    %159 = tpu.matmul %158, %156, %cst_70 {dimension_numbers = #tpu.dot_dimension_numbers<[1], [0], [0], [1], [0, 0, 1, 1], [], []>} : vector<8x8xf32>, vector<8x256xf32>, vector<8x256xf32> -> vector<8x256xf32>
    %160 = arith.addf %152, %159 : vector<8x256xf32>
    %c255_i32_71 = arith.constant 255 : i32
    %161 = tpu.dynamic_rotate %115 by %c255_i32_71 dim 1 : vector<8x256xf32>, i32 -> vector<8x256xf32>
    %162 = vector.extract_strided_slice %1 {offsets = [5, 0, 0], sizes = [1, 1, 256], strides = [1, 1, 1]} : vector<9x1x256xf32> to vector<1x1x256xf32>
    %163 = vector.shape_cast %162 : vector<1x1x256xf32> to vector<1x256xf32>
    %164 = vector.broadcast %163 : vector<1x256xf32> to vector<8x256xf32>
    %165 = arith.mulf %164, %161 : vector<8x256xf32>
    %c5_72 = arith.constant 5 : index
    %c0_73 = arith.constant 0 : index
    %c0_74 = arith.constant 0 : index
    %166 = vector.load %arg6[%c5_72, %c0_73, %c0_74] : memref<9x8x8xf32, #tpu.memory_space<vmem>>, vector<1x8x8xf32>
    %167 = vector.shape_cast %166 : vector<1x8x8xf32> to vector<8x8xf32>
    %cst_75 = arith.constant dense<0.000000e+00> : vector<8x256xf32>
    %168 = tpu.matmul %167, %165, %cst_75 {dimension_numbers = #tpu.dot_dimension_numbers<[1], [0], [0], [1], [0, 0, 1, 1], [], []>} : vector<8x8xf32>, vector<8x256xf32>, vector<8x256xf32> -> vector<8x256xf32>
    %169 = arith.addf %160, %168 : vector<8x256xf32>
    %c241_i32_76 = arith.constant 241 : i32
    %170 = tpu.dynamic_rotate %115 by %c241_i32_76 dim 1 : vector<8x256xf32>, i32 -> vector<8x256xf32>
    %171 = vector.extract_strided_slice %1 {offsets = [6, 0, 0], sizes = [1, 1, 256], strides = [1, 1, 1]} : vector<9x1x256xf32> to vector<1x1x256xf32>
    %172 = vector.shape_cast %171 : vector<1x1x256xf32> to vector<1x256xf32>
    %173 = vector.broadcast %172 : vector<1x256xf32> to vector<8x256xf32>
    %174 = arith.mulf %173, %170 : vector<8x256xf32>
    %c6_77 = arith.constant 6 : index
    %c0_78 = arith.constant 0 : index
    %c0_79 = arith.constant 0 : index
    %175 = vector.load %arg6[%c6_77, %c0_78, %c0_79] : memref<9x8x8xf32, #tpu.memory_space<vmem>>, vector<1x8x8xf32>
    %176 = vector.shape_cast %175 : vector<1x8x8xf32> to vector<8x8xf32>
    %cst_80 = arith.constant dense<0.000000e+00> : vector<8x256xf32>
    %177 = tpu.matmul %176, %174, %cst_80 {dimension_numbers = #tpu.dot_dimension_numbers<[1], [0], [0], [1], [0, 0, 1, 1], [], []>} : vector<8x8xf32>, vector<8x256xf32>, vector<8x256xf32> -> vector<8x256xf32>
    %178 = arith.addf %169, %177 : vector<8x256xf32>
    %c240_i32_81 = arith.constant 240 : i32
    %179 = tpu.dynamic_rotate %115 by %c240_i32_81 dim 1 : vector<8x256xf32>, i32 -> vector<8x256xf32>
    %180 = vector.extract_strided_slice %1 {offsets = [7, 0, 0], sizes = [1, 1, 256], strides = [1, 1, 1]} : vector<9x1x256xf32> to vector<1x1x256xf32>
    %181 = vector.shape_cast %180 : vector<1x1x256xf32> to vector<1x256xf32>
    %182 = vector.broadcast %181 : vector<1x256xf32> to vector<8x256xf32>
    %183 = arith.mulf %182, %179 : vector<8x256xf32>
    %c7_82 = arith.constant 7 : index
    %c0_83 = arith.constant 0 : index
    %c0_84 = arith.constant 0 : index
    %184 = vector.load %arg6[%c7_82, %c0_83, %c0_84] : memref<9x8x8xf32, #tpu.memory_space<vmem>>, vector<1x8x8xf32>
    %185 = vector.shape_cast %184 : vector<1x8x8xf32> to vector<8x8xf32>
    %cst_85 = arith.constant dense<0.000000e+00> : vector<8x256xf32>
    %186 = tpu.matmul %185, %183, %cst_85 {dimension_numbers = #tpu.dot_dimension_numbers<[1], [0], [0], [1], [0, 0, 1, 1], [], []>} : vector<8x8xf32>, vector<8x256xf32>, vector<8x256xf32> -> vector<8x256xf32>
    %187 = arith.addf %178, %186 : vector<8x256xf32>
    %c239_i32_86 = arith.constant 239 : i32
    %188 = tpu.dynamic_rotate %115 by %c239_i32_86 dim 1 : vector<8x256xf32>, i32 -> vector<8x256xf32>
    %189 = vector.extract_strided_slice %1 {offsets = [8, 0, 0], sizes = [1, 1, 256], strides = [1, 1, 1]} : vector<9x1x256xf32> to vector<1x1x256xf32>
    %190 = vector.shape_cast %189 : vector<1x1x256xf32> to vector<1x256xf32>
    %191 = vector.broadcast %190 : vector<1x256xf32> to vector<8x256xf32>
    %192 = arith.mulf %191, %188 : vector<8x256xf32>
    %c8_87 = arith.constant 8 : index
    %c0_88 = arith.constant 0 : index
    %c0_89 = arith.constant 0 : index
    %193 = vector.load %arg6[%c8_87, %c0_88, %c0_89] : memref<9x8x8xf32, #tpu.memory_space<vmem>>, vector<1x8x8xf32>
    %194 = vector.shape_cast %193 : vector<1x8x8xf32> to vector<8x8xf32>
    %cst_90 = arith.constant dense<0.000000e+00> : vector<8x256xf32>
    %195 = tpu.matmul %194, %192, %cst_90 {dimension_numbers = #tpu.dot_dimension_numbers<[1], [0], [0], [1], [0, 0, 1, 1], [], []>} : vector<8x8xf32>, vector<8x256xf32>, vector<8x256xf32> -> vector<8x256xf32>
    %196 = arith.addf %187, %195 : vector<8x256xf32>
    %c0_91 = arith.constant 0 : index
    %c0_92 = arith.constant 0 : index
    %197 = vector.load %arg7[%c0_91, %c0_92] : memref<8x1xf32, #tpu.memory_space<vmem>>, vector<8x1xf32>
    %198 = vector.broadcast %197 : vector<8x1xf32> to vector<8x256xf32>
    %199 = arith.addf %196, %198 : vector<8x256xf32>
    %200 = arith.negf %199 : vector<8x256xf32>
    %201 = math.exp %200 : vector<8x256xf32>
    %cst_93 = arith.constant 1.000000e+00 : f32
    %202 = vector.broadcast %cst_93 : f32 to vector<8x256xf32>
    %203 = arith.addf %202, %201 : vector<8x256xf32>
    %204 = arith.divf %202, %203 : vector<8x256xf32>
    %205 = arith.mulf %199, %204 : vector<8x256xf32>
    %c0_94 = arith.constant 0 : index
    %c0_95 = arith.constant 0 : index
    %206 = vector.load %arg9[%c0_94, %c0_95] : memref<8x256xf32, #tpu.memory_space<vmem>>, vector<8x256xf32>
    tpu.vector_store %arg9[%c0_94, %c0_95], %205 {strides = array<i32>} : memref<8x256xf32, #tpu.memory_space<vmem>>, vector<8x256xf32>,
    return
  }
  func.func @transform_0(%arg0: i32) -> (i32, i32) {
    %c0_i32 = arith.constant 0 : i32
    %c0_i32_0 = arith.constant 0 : i32
    return %c0_i32, %arg0 : i32, i32
  }
  func.func @transform_1(%arg0: i32) -> (i32, i32) {
    %c0_i32 = arith.constant 0 : i32
    %c0_i32_0 = arith.constant 0 : i32
    %c0_i32_1 = arith.constant 0 : i32
    return %c0_i32, %c0_i32_0 : i32, i32
  }
  func.func @transform_2(%arg0: i32) -> (i32, i32) {
    %c0_i32 = arith.constant 0 : i32
    %c0_i32_0 = arith.constant 0 : i32
    %c0_i32_1 = arith.constant 0 : i32
    return %c0_i32, %c0_i32_0 : i32, i32
  }
  func.func @transform_3(%arg0: i32) -> (i32, i32, i32) {
    %c0_i32 = arith.constant 0 : i32
    %c0_i32_0 = arith.constant 0 : i32
    %c0_i32_1 = arith.constant 0 : i32
    %c0_i32_2 = arith.constant 0 : i32
    return %c0_i32, %c0_i32_0, %c0_i32_1 : i32, i32, i32
  }
  func.func @transform_4(%arg0: i32) -> (i32, i32) {
    %c0_i32 = arith.constant 0 : i32
    %c0_i32_0 = arith.constant 0 : i32
    %c0_i32_1 = arith.constant 0 : i32
    return %c0_i32, %c0_i32_0 : i32, i32
  }
  func.func @transform_5(%arg0: i32) -> (i32, i32, i32) {
    %c0_i32 = arith.constant 0 : i32
    %c0_i32_0 = arith.constant 0 : i32
    %c0_i32_1 = arith.constant 0 : i32
    %c0_i32_2 = arith.constant 0 : i32
    return %c0_i32, %c0_i32_0, %c0_i32_1 : i32, i32, i32
  }
  func.func @transform_6(%arg0: i32) -> (i32, i32) {
    %c0_i32 = arith.constant 0 : i32
    %c0_i32_0 = arith.constant 0 : i32
    %c0_i32_1 = arith.constant 0 : i32
    return %c0_i32, %c0_i32_0 : i32, i32
  }
  func.func @transform_7(%arg0: i32) -> (i32, i32, i32) {
    %c0_i32 = arith.constant 0 : i32
    %c0_i32_0 = arith.constant 0 : i32
    %c0_i32_1 = arith.constant 0 : i32
    %c0_i32_2 = arith.constant 0 : i32
    return %c0_i32, %c0_i32_0, %c0_i32_1 : i32, i32, i32
  }
  func.func @transform_8(%arg0: i32) -> (i32, i32) {
    %c0_i32 = arith.constant 0 : i32
    %c0_i32_0 = arith.constant 0 : i32
    return %c0_i32, %arg0 : i32, i32
  }
}

</mosaic_0001>

<bundles_post_ra>
// kernel: block_forward.1
= control target key start
LH: loop header
LB: loop body
LE: loop exit
PB: predicated region body
PF: predicated region fallthrough
CT: control target
= control target key end

     0   :  { %s2359_s27 = smov 0   ;;  %s2768_s0 = inlined_call_operand.vmem [shape: f32[4,512], index: 0, kind: input, shape index: {}]   ;;  %s2769_s1 = inlined_call_operand.vmem [shape: f32[4,256], index: 1, kind: input, shape index: {}]   ;;  %s2770_s2 = inlined_call_operand.vmem [shape: f32[4,256], index: 2, kind: input, shape index: {}]   ;;  %s2771_s3 = inlined_call_operand.vmem [shape: f32[9,8,4], index: 3, kind: input, shape index: {}]   ;;  %s2772_s4 = inlined_call_operand.vmem [shape: f32[8,1], index: 4, kind: input, shape index: {}]   ;;  %s2773_s5 = inlined_call_operand.vmem [shape: f32[9,8,8], index: 5, kind: input, shape index: {}]   ;;  %s2774_s6 = inlined_call_operand.vmem [shape: f32[8,1], index: 6, kind: input, shape index: {}]   ;;  %s2775_s7 = inlined_call_operand.vmem [shape: f32[9,1,256], index: 7, kind: input, shape index: {}]   ;;  %s2776_s8 = inlined_call_operand.vmem [shape: f32[8,512], index: 8, kind: output, shape index: {}]  }
   0x1 LB: > { %s2158_s28 = sadd.s32 4294967295, %s2302_s27   ;;  %p2162_p0 = scmp.ge.s32.totalorder %s2302_s27, 1  ;;  %s2302_s27 = sphi %s2359_s27, %s18_s27  }
   0x2   : > { %p263_p1 = scmp.lt.s32.totalorder %s2302_s27, 3 }
   0x4   : > { %p264_p2 = pnand %p2162_p0, %p263_p1 }
   0x5   : > { %s2163_s29 = sshll.u32 (!%p264_p2), %s2158_s28, 1  ;;  %vm322_vm0 = vcmask (!%p264_p2), 1043456   ;;  %v358_v31 = vld [vmem:[%s2769_s1] sm:$0xff] (!%p264_p2)  ;;  %v2304_v35 = vmov (!%p264_p2), 0.0   ;;  %s2305_s16 = smov (!%p264_p2), 17   ;;  %v2313_v39 = vmov (!%p264_p2), 0   ;;  %v369_v40 = vlaneseq (!%p264_p2) }
   0x6   : > { %267 = sbr.rel (%p264_p2) target bundleno = 1223 (0x4c7), region = 52  ;;  %p298_p3 = scmp.lt.s32.totalorder (!%p264_p2), %s2163_s29, 3  ;;  %v360_v33 = vld [vmem:[%s2770_s2] sm:$0xff] (!%p264_p2)  ;;  %484 = vmatprep.mubr.f32.mxu0 (!%p264_p2), %v2304_v35  ;;  %1401 = vmatprep.mubr.f32.mxu1 (!%p264_p2), %v2304_v35  ;;  %v2167_v57 = vld [vmem:[%s2771_s3 + $0x8] sm:$0xff] (!%p264_p2)  ;;  %vm410_vm3 = vcmask (!%p264_p2), 31744   ;;  %vm1333_vm10 = vcmask (!%p264_p2), 64512  }
   0x7   : > { %s2306_s17 = smov (!%p264_p2), 16   ;;  %s2307_s18 = smov (!%p264_p2), 127   ;;  %v1292_v38 = vld [vmem:[%s2772_s4] sm:$0xff] (!%p264_p2)  ;;  %2275 = vset.pattern.permute.xlu1 (!%p264_p2), %v2313_v39  ;;  %2276 = vset.pattern.permute.xlu0 (!%p264_p2), %v2313_v39  ;;  %v376_v41 = vshrl.u32 (!%p264_p2), %v369_v40, 7  ;;  %v2428_v42 = vand.u32 (!%p264_p2), 127, %v369_v40 }
   0x8   : > { %s2308_s19 = smov (!%p264_p2), 113   ;;  %s2309_s20 = smov (!%p264_p2), 112   ;;  %v311_v43 = vld [vmem:[%s2775_s7 + $0x2] sm:$0x3] (!%p264_p2)  ;;  %v310_v49 = vld [vmem:[%s2775_s7] sm:$0x3] (!%p264_p2) }
   0x9   : > { %s2310_s21 = smov (!%p264_p2), 15   ;;  %s2311_s22 = smov (!%p264_p2), 111   ;;  %v2433_v45 = vsub.s32 (!%p264_p2), 0, %v376_v41  ;;  %v2435_v46 = vsub.s32 (!%p264_p2), 1, %v376_v41  ;;  %vm392_vm1 = vcmp.lt.s32.totalorder (!%p264_p2), %v2428_v42, 16  ;;  %vm371_vm2 = vcmp.lt.s32.totalorder (!%p264_p2), %v2428_v42, 17 }
   0xa   : > { %s2312_s23 = smov (!%p264_p2), 1   ;;  %vm575_vm4 = vcmp.lt.s32.totalorder (!%p264_p2), %v2428_v42, 15  ;;  %vm679_vm5 = vcmp.lt.s32.totalorder (!%p264_p2), %v2428_v42, 1  ;;  %vm880_vm6 = vcmp.lt.s32.totalorder (!%p264_p2), %v2428_v42, 127  ;;  %vm984_vm7 = vcmp.lt.s32.totalorder (!%p264_p2), %v2428_v42, 113  ;;  %v2182_v40 = vld [vmem:[%s2771_s3 + $0x20] sm:$0xff] (!%p264_p2) }
   0xb   : > { %v2439_v47 = vrot.slane (!%p264_p2), %v311_v43, %v2433_v45  ;;  %v2442_v48 = vrot.slane (!%p264_p2), %v311_v43, %v2435_v46  ;;  %v2455_v55 = vrot.slane (!%p264_p2), %v310_v49, %v2433_v45  ;;  %v2458_v56 = vrot.slane (!%p264_p2), %v310_v49, %v2435_v46 }
   0xc   : > { %vm1088_vm8 = vcmp.lt.s32.totalorder (!%p264_p2), %v2428_v42, 112  ;;  %vm1192_vm9 = vcmp.lt.s32.totalorder (!%p264_p2), %v2428_v42, 111 }
   0xd   : > { %s2778_s29 = smov (!%p298_p3, %s2163_s29), 3 }
   0xe   : > { %s2164_s30 = sshll.u32 %s2778_s29, 2 }
   0xf   : > { %s301_s11 = scalar_lea.vmem %s2768_s0, %s2164_s30 }
  0x10   : > { %v309_v0 = vld [vmem:[%s301_s11] sm:$0xff] }
  0x11   : > { %v320_v1 = vcombine.high %v309_v0, %v309_v0  ;;  %v323_v2 = vsel %vm322_vm0, %v309_v0, 0.0 }
  0x13   : > { %v324_v3 = vsel %vm322_vm0, %v320_v1, 0.0 }
  0x14   : > { %v325_v4 = vadd.f32 %v324_v3, %v323_v2 }
  0x16   : > { %326 = vadd.xlane.f32.xlu0 %v325_v4  ;;  %v387_v4 = vld [vmem:[%s2771_s3] sm:$0xff] }
  0xa3   : > { %v327_v5 = vpop.xlane.xlu0 %326 }
  0xa4   : > { %v328_v6 = vsel %vm322_vm0, %v327_v5, 0.0 }
  0xa5   : > { %v329_v7 = vrot.slane %v328_v6, 4 }
  0xa7   : > { %v330_v8 = vadd.f32 %v329_v7, %v328_v6 }
  0xa9   : > { %v331_v9 = vrot.slane %v330_v8, 2 }
  0xab   : > { %v332_v10 = vadd.f32 %v331_v9, %v330_v8 }
  0xad   : > { %v333_v11 = vrot.slane %v332_v10, 1 }
  0xaf   : > { %v334_v12 = vadd.f32 %v333_v11, %v332_v10  ;;  %v313_v10 = vld [vmem:[%s2775_s7 + $0x6] sm:$0x3] }
  0xb1   : > { %v336_v13 = vmul.f32 0.0009765625, %v334_v12  ;;  %v2503_v12 = vrot.slane %v313_v10, %v2433_v45 }
  0xb3   : > { %v337_v14 = vsub.f32 %v309_v0, %v336_v13  ;;  %v312_v0 = vld [vmem:[%s2775_s7 + $0x4] sm:$0x3]  ;;  %v2506_v13 = vrot.slane %v313_v10, %v2435_v46 }
  0xb4   : > { %v2480_v2 = vrot.slane %v312_v0, %v2433_v45  ;;  %v2483_v3 = vrot.slane %v312_v0, %v2435_v46 }
  0xb5   : > { %v338_v15 = vmul.f32 %v337_v14, %v337_v14 }
  0xb7   : > { %v340_v16 = vcombine.high %v338_v15, %v338_v15  ;;  %v342_v17 = vsel %vm322_vm0, %v338_v15, 0.0  ;;  %v314_v15 = vld [vmem:[%s2775_s7 + $0x8] sm:$0x3] }
  0xb9   : > { %v343_v18 = vsel %vm322_vm0, %v340_v16, 0.0 }
  0xba   : > { %v344_v19 = vadd.f32 %v343_v18, %v342_v17  ;;  %v2515_v17 = vrot.slane %v314_v15, %v2435_v46 }
  0xbc   : > { %345 = vadd.xlane.f32.xlu0 %v344_v19 }
 0x149   : > { %v346_v20 = vpop.xlane.xlu0 %345 }
 0x14a   : > { %v347_v21 = vsel %vm322_vm0, %v346_v20, 0.0 }
 0x14b   : > { %v348_v22 = vrot.slane %v347_v21, 4 }
 0x14d   : > { %v349_v23 = vadd.f32 %v348_v22, %v347_v21  ;;  %v315_v22 = vld [vmem:[%s2775_s7 + $0xa] sm:$0x3] }
 0x14f   : > { %v350_v24 = vrot.slane %v349_v23, 2 }
 0x151   : > { %v351_v25 = vadd.f32 %v350_v24, %v349_v23 }
 0x153   : > { %v352_v26 = vrot.slane %v351_v25, 1 }
 0x155   : > { %v353_v27 = vadd.f32 %v352_v26, %v351_v25  ;;  %v2534_v25 = vrot.slane %v314_v15, %v2433_v45 }
 0x157   : > { %v354_v28 = vmul.f32 0.0009765625, %v353_v27  ;;  %v2537_v27 = vrot.slane %v315_v22, %v2435_v46 }
 0x159   : > { %v355_v29 = vadd.f32 1e-05, %v354_v28 }
 0x15b   : > { %2278 = vrsqrt.f32 %v355_v29  ;;  %v2178_v29 = vld [vmem:[%s2771_s3 + $0x18] sm:$0xff] }
 0x165   : > { %v2279_v30 = vpop.eup %2278 }
 0x166   : > { %v357_v32 = vmul.f32 %v2279_v30, %v337_v14  ;;  %v2174_v14 = vld [vmem:[%s2771_s3 + $0x10] sm:$0xff] }
 0x168   : > { %v359_v34 = vmul.f32 %v358_v31, %v357_v32  ;;  %v316_v32 = vld [vmem:[%s2775_s7 + $0xc] sm:$0x3] }
 0x16a   : > { %v2387_v36 = vadd.f32 %v360_v33, %v359_v34  ;;  %v2557_v34 = vrot.slane %v315_v22, %v2433_v45 }
 0x16c   : > { %365 = vrot.lane.b32.xlu0 %v2387_v36, %s2305_s16  ;;  %388 = vrot.lane.b32.xlu1 %v2387_v36, %s2306_s17  ;;  %v2395_v37 = vcombine.high %v2387_v36, %v2387_v36  ;;  %v790_v30 = vmul.f32 %v2534_v25, %v2387_v36 }
 0x16e   : > { %v791_v24 = vmul.f32 %v2515_v17, %v2395_v37 }
 0x170   : > { %878 = vrot.lane.b32.xlu0 %v2395_v37, %s2307_s18  ;;  %390 = vrot.lane.b32.xlu1 %v2395_v37, %s2306_s17 }
 0x174   : > { %982 = vrot.lane.b32.xlu0 %v2395_v37, %s2308_s19  ;;  %367 = vrot.lane.b32.xlu1 %v2395_v37, %s2305_s16 }
 0x178   : > { %1086 = vrot.lane.b32.xlu0 %v2395_v37, %s2309_s20  ;;  %571 = vrot.lane.b32.xlu1 %v2387_v36, %s2310_s21 }
 0x17c   : > { %1190 = vrot.lane.b32.xlu0 %v2395_v37, %s2311_s22  ;;  %573 = vrot.lane.b32.xlu1 %v2395_v37, %s2310_s21 }
 0x180   : > { %675 = vrot.lane.b32.xlu1 %v2387_v36, %s2312_s23 }
 0x184   : > { %677 = vrot.lane.b32.xlu1 %v2395_v37, %s2312_s23 }
 0x188   : > { %876 = vrot.lane.b32.xlu1 %v2387_v36, %s2307_s18 }
 0x18c   : > { %980 = vrot.lane.b32.xlu1 %v2387_v36, %s2308_s19 }
 0x190   : > { %1084 = vrot.lane.b32.xlu1 %v2387_v36, %s2309_s20 }
 0x194   : > { %1188 = vrot.lane.b32.xlu1 %v2387_v36, %s2311_s22 }
 0x198   : > { %1295 = vperm.xlu1 %2275, %v1292_v38   ;;  %v2562_v38 = vrot.slane %v316_v32, %v2435_v46 }
 0x1de   : > { %v389_v44 = vpop.permute.xlu1 %388  ;;  %v366_v58 = vpop.permute.xlu0 %365 }
 0x1e2   : > { %v391_v50 = vpop.permute.xlu1 %390  ;;  %v879_v26 = vpop.permute.xlu0 %878 }
 0x1e3   : > { %v393_v51 = vsel %vm392_vm1, %v389_v44, %v391_v50  ;;  %v394_v52 = vsel %vm392_vm1, %v391_v50, %v389_v44  ;;  %v317_v44 = vld [vmem:[%s2775_s7 + $0xe] sm:$0x3]  ;;  %v2580_v50 = vrot.slane %v316_v32, %v2433_v45 }
 0x1e4   : > { %v406_v53 = vmul.f32 %v2439_v47, %v394_v52  ;;  %v407_v54 = vmul.f32 %v2442_v48, %v393_v51 }
 0x1e6   : > { %2168 = vmatprep.subr.msk.mxu0 %vm322_vm0, %v407_v54  ;;  %v368_v59 = vpop.permute.xlu1 %367  ;;  %v983_v36 = vpop.permute.xlu0 %982 }
 0x1e7   : > { %v372_v60 = vsel %vm371_vm2, %v366_v58, %v368_v59  ;;  %v373_v61 = vsel %vm371_vm2, %v368_v59, %v366_v58  ;;  %2169 = vmatpush1.msk.msra.mxu0 %vm322_vm0, %v406_v53  ;;  %v2585_v53 = vrot.slane %v317_v44, %v2435_v46 }
 0x1e8   : > { %v385_v62 = vmul.f32 %v2455_v55, %v373_v61  ;;  %v386_v63 = vmul.f32 %v2458_v56, %v372_v60  ;;  %2170 = vmatmul.mubr.msk.f32.vlgmr.msra.gmra.mrb[0].mxu0 %vm410_vm3, %v2167_v57  ;;  %v2186_v57 = vld [vmem:[%s2771_s3 + $0x28] sm:$0xff]  ;;  %v318_v60 = vld [vmem:[%s2775_s7 + $0x10] sm:$0x3] }
 0x1e9   : > { %564 = vmatprep.mubr.f32.mxu0 %v2304_v35 }
 0x1ea   : > { %2171 = vmatprep.subr.msk.mxu0 %vm322_vm0, %v386_v63  ;;  %v572_v1 = vpop.permute.xlu1 %571  ;;  %v1087_v51 = vpop.permute.xlu0 %1086 }
 0x1eb   : > { %2172 = vmatpush1.msk.msra.mxu0 %vm322_vm0, %v385_v62  ;;  %v2603_v62 = vrot.slane %v317_v44, %v2433_v45 }
 0x1ee   : > { %v574_v5 = vpop.permute.xlu1 %573  ;;  %v1191_v63 = vpop.permute.xlu0 %1190 }
 0x1ef   : > { %v576_v6 = vsel %vm575_vm4, %v572_v1, %v574_v5  ;;  %v577_v7 = vsel %vm575_vm4, %v574_v5, %v572_v1  ;;  %v2608_v1 = vrot.slane %v318_v60, %v2435_v46  ;;  %v2190_v5 = vld [vmem:[%s2771_s3 + $0x30] sm:$0xff]  ;;  %v2622_v46 = vrot.slane %v318_v60, %v2433_v45  ;;  %v2198_v45 = vld [vmem:[%s2771_s3 + $0x40] sm:$0xff] }
 0x1f0   : > { %v589_v8 = vmul.f32 %v2480_v2, %v577_v7  ;;  %v590_v9 = vmul.f32 %v2483_v3, %v576_v6  ;;  %2173 = vmatmul.mubr.msk.f32.vlgmr.msra.gmra.mrb[0].mxu0 %vm410_vm3, %v387_v4 }
 0x1f1   : > { %666 = vmatprep.mubr.f32.mxu0 %v2304_v35 }
 0x1f2   : > { %2175 = vmatprep.subr.msk.mxu0 %vm322_vm0, %v590_v9  ;;  %v676_v11 = vpop.permute.xlu1 %675  ;;  %v2194_v9 = vld [vmem:[%s2771_s3 + $0x38] sm:$0xff] }
 0x1f3   : > { %2176 = vmatpush1.msk.msra.mxu0 %vm322_vm0, %v589_v8 }
 0x1f6   : > { %v678_v16 = vpop.permute.xlu1 %677 }
 0x1f7   : > { %v680_v18 = vsel %vm679_vm5, %v676_v11, %v678_v16  ;;  %v681_v19 = vsel %vm679_vm5, %v678_v16, %v676_v11 }
 0x1f8   : > { %v693_v20 = vmul.f32 %v2503_v12, %v681_v19  ;;  %v694_v21 = vmul.f32 %v2506_v13, %v680_v18  ;;  %2177 = vmatmul.mubr.msk.f32.vlgmr.msra.gmra.mrb[0].mxu0 %vm410_vm3, %v2174_v14 }
 0x1f9   : > { %770 = vmatprep.mubr.f32.mxu0 %v2304_v35 }
 0x1fa   : > { %2179 = vmatprep.subr.msk.mxu0 %vm322_vm0, %v694_v21  ;;  %v877_v23 = vpop.permute.xlu1 %876 }
 0x1fb   : > { %2180 = vmatpush1.msk.msra.mxu0 %vm322_vm0, %v693_v20  ;;  %v882_v28 = vsel %vm880_vm6, %v879_v26, %v877_v23  ;;  %v881_v37 = vsel %vm880_vm6, %v877_v23, %v879_v26 }
 0x1fc   : > { %2183 = vmatprep.subr.msk.mxu0 %vm322_vm0, %v791_v24  ;;  %v895_v31 = vmul.f32 %v2537_v27, %v882_v28  ;;  %v894_v41 = vmul.f32 %v2557_v34, %v881_v37 }
 0x1fe   : > { %v981_v33 = vpop.permute.xlu1 %980 }
 0x1ff   : > { %v986_v39 = vsel %vm984_vm7, %v983_v36, %v981_v33  ;;  %v985_v52 = vsel %vm984_vm7, %v981_v33, %v983_v36 }
 0x200   : > { %2181 = vmatmul.mubr.msk.f32.vlgmr.msra.gmra.mrb[0].mxu0 %vm410_vm3, %v2178_v29  ;;  %v999_v43 = vmul.f32 %v2562_v38, %v986_v39  ;;  %v998_v58 = vmul.f32 %v2580_v50, %v985_v52 }
 0x201   : > { %2184 = vmatpush1.msk.msra.mxu0 %vm322_vm0, %v790_v30  ;;  %867 = vmatprep.mubr.f32.mxu0 %v2304_v35 }
 0x202   : > { %2187 = vmatprep.subr.msk.mxu0 %vm322_vm0, %v895_v31  ;;  %v1085_v49 = vpop.permute.xlu1 %1084  ;;  %v2078_v31 = vld [vmem:[%s2774_s6] sm:$0xff] }
 0x203   : > { %v1090_v54 = vsel %vm1088_vm8, %v1087_v51, %v1085_v49  ;;  %v1089_v0 = vsel %vm1088_vm8, %v1085_v49, %v1087_v51 }
 0x204   : > { %v1103_v59 = vmul.f32 %v2585_v53, %v1090_v54  ;;  %v1102_v6 = vmul.f32 %v2603_v62, %v1089_v0 }
 0x206   : > { %v1189_v61 = vpop.permute.xlu1 %1188 }
 0x207   : > { %v1194_v4 = vsel %vm1192_vm9, %v1191_v63, %v1189_v61  ;;  %v1193_v8 = vsel %vm1192_vm9, %v1189_v61, %v1191_v63 }
 0x208   : > { %2185 = vmatmul.mubr.msk.f32.vlgmr.msra.gmra.mrb[0].mxu0 %vm410_vm3, %v2182_v40  ;;  %v1207_v7 = vmul.f32 %v2608_v1, %v1194_v4  ;;  %v1206_v10 = vmul.f32 %v2622_v46, %v1193_v8  ;;  %v2207_v4 = vld [vmem:[%s2773_s5 + $0x10] sm:$0xff]  ;;  %v2209_v8 = vld [vmem:[%s2773_s5 + $0x18] sm:$0xff] }
 0x209   : > { %2188 = vmatpush1.msk.msra.mxu0 %vm322_vm0, %v894_v41  ;;  %971 = vmatprep.mubr.f32.mxu0 %v2304_v35 }
 0x20a   : > { %2191 = vmatprep.subr.msk.mxu0 %vm322_vm0, %v999_v43  ;;  %v2204_v43 = vld [vmem:[%s2773_s5 + $0x8] sm:$0xff] }
 0x210   : > { %2189 = vmatmul.mubr.msk.f32.vlgmr.msra.gmra.mrb[0].mxu0 %vm410_vm3, %v2186_v57 }
 0x211   : > { %2192 = vmatpush1.msk.msra.mxu0 %vm322_vm0, %v998_v58  ;;  %1075 = vmatprep.mubr.f32.mxu0 %v2304_v35 }
 0x212   : > { %2195 = vmatprep.subr.msk.mxu0 %vm322_vm0, %v1103_v59 }
 0x217   : > { %v1296_v11 = vpop.permute.xlu1 %1295 }
 0x218   : > { %2193 = vmatmul.mubr.msk.f32.vlgmr.msra.gmra.mrb[0].mxu0 %vm410_vm3, %v2190_v5 }
 0x219   : > { %2196 = vmatpush1.msk.msra.mxu0 %vm322_vm0, %v1102_v6  ;;  %1179 = vmatprep.mubr.f32.mxu0 %v2304_v35 }
 0x21a   : > { %2199 = vmatprep.subr.msk.mxu0 %vm322_vm0, %v1207_v7 }
 0x220   : > { %2197 = vmatmul.mubr.msk.f32.vlgmr.msra.gmra.mrb[0].mxu0 %vm410_vm3, %v2194_v9 }
 0x221   : > { %2200 = vmatpush1.msk.msra.mxu0 %vm322_vm0, %v1206_v10  ;;  %1283 = vmatprep.mubr.f32.mxu0 %v2304_v35 }
 0x228   : > { %2201 = vmatmul.mubr.msk.f32.vlgmr.msra.gmra.mrb[0].mxu0 %vm410_vm3, %v2198_v45 }
 0x2fb   : > { %v1285_v14 = vpop.f32.mrb[0].mxu0 }
 0x2fc   : > { %v1298_v15 = vadd.f32 %v1296_v11, %v1285_v14  ;;  %v1287_v16 = vpop.f32.mrb[1].mxu0 }
 0x2fd   : > { %v1299_v18 = vadd.f32 %v1296_v11, %v1287_v16 }
 0x2fe   : > { %v2202_v19 = vmul.f32 -1.442695, %v1298_v15 }
 0x2ff   : > { %v2203_v20 = vmul.f32 -1.442695, %v1299_v18 }
 0x300   : > { %2280 = vpow2.f32 %v2202_v19 }
 0x301   : > { %2282 = vpow2.f32 %v2203_v20 }
 0x30a   : > { %v2281_v21 = vpop.eup %2280 }
 0x30b   : > { %v2283_v22 = vpop.eup %2282  ;;  %v1306_v23 = vadd.f32 1.0, %v2281_v21 }
 0x30c   : > { %v1307_v24 = vadd.f32 1.0, %v2283_v22 }
 0x30d   : > { %2284 = vrcp.f32 %v1306_v23 }
 0x30e   : > { %2286 = vrcp.f32 %v1307_v24 }
 0x317   : > { %v2285_v26 = vpop.eup %2284 }
 0x318   : > { %v2287_v28 = vpop.eup %2286  ;;  %v2637_v29 = vmul.f32 %v2285_v26, %v1298_v15 }
 0x319   : > { %v1313_v30 = vmul.f32 %v2287_v28, %v1299_v18 }
 0x31a   : > { %1323 = vrot.lane.b32.xlu0 %v2637_v29, %s2306_s17 }
 0x31b   : > { %1325 = vrot.lane.b32.xlu1 %v1313_v30, %s2306_s17  ;;  %v1655_v5 = vmul.f32 %v1313_v30, %v2515_v17 }
 0x31e   : > { %1314 = vrot.lane.b32.xlu0 %v2637_v29, %s2305_s16 }
 0x31f   : > { %1316 = vrot.lane.b32.xlu1 %v1313_v30, %s2305_s16  ;;  %s2166_s16 = sshll.u32 %s2778_s29, 3 }
 0x322   : > { %1482 = vrot.lane.b32.xlu0 %v2637_v29, %s2310_s21 }
 0x323   : > { %1484 = vrot.lane.b32.xlu1 %v1313_v30, %s2310_s21 }
 0x326   : > { %1568 = vrot.lane.b32.xlu0 %v2637_v29, %s2312_s23 }
 0x327   : > { %1570 = vrot.lane.b32.xlu1 %v1313_v30, %s2312_s23 }
 0x32a   : > { %1734 = vrot.lane.b32.xlu0 %v2637_v29, %s2307_s18 }
 0x32b   : > { %1736 = vrot.lane.b32.xlu1 %v1313_v30, %s2307_s18 }
 0x32e   : > { %1820 = vrot.lane.b32.xlu0 %v2637_v29, %s2308_s19 }
 0x32f   : > { %1822 = vrot.lane.b32.xlu1 %v1313_v30, %s2308_s19  ;;  %s307_s19 = scalar_lea.vmem %s2776_s8, %s2166_s16 }
 0x332   : > { %1906 = vrot.lane.b32.xlu0 %v2637_v29, %s2309_s20 }
 0x333   : > { %1908 = vrot.lane.b32.xlu1 %v1313_v30, %s2309_s20 }
 0x336   : > { %1992 = vrot.lane.b32.xlu0 %v2637_v29, %s2311_s22 }
 0x337   : > { %1994 = vrot.lane.b32.xlu1 %v1313_v30, %s2311_s22 }
 0x33a   : > { %2081 = vperm.xlu0 %2276, %v2078_v31  }
 0x38c   : > { %v1324_v32 = vpop.permute.xlu0 %1323 }
 0x38d   : > { %v1326_v33 = vpop.permute.xlu1 %1325 }
 0x38e   : > { %v1328_v36 = vsel %vm392_vm1, %v1326_v33, %v1324_v32  ;;  %v1327_v37 = vsel %vm392_vm1, %v1324_v32, %v1326_v33 }
 0x38f   : > { %v1330_v39 = vmul.f32 %v1327_v37, %v2442_v48  ;;  %v1329_v40 = vmul.f32 %v1328_v36, %v2439_v47 }
 0x390   : > { %v1315_v41 = vpop.permute.xlu0 %1314 }
 0x391   : > { %1337 = vmatprep.subr.mxu1 %v1330_v39  ;;  %v1317_v44 = vpop.permute.xlu1 %1316 }
 0x392   : > { %v1318_v49 = vsel %vm371_vm2, %v1315_v41, %v1317_v44  ;;  %v1319_v51 = vsel %vm371_vm2, %v1317_v44, %v1315_v41  ;;  %1338 = vmatpush1.msra.mxu1 %v1329_v40 }
 0x393   : > { %v1320_v52 = vmul.f32 %v1319_v51, %v2455_v55  ;;  %v1321_v48 = vmul.f32 %v1318_v49, %v2458_v56  ;;  %2205 = vmatmul.mubr.msk.f32.vlgmr.msra.gmra.mrb[0].mxu1 %vm1333_vm10, %v2204_v43  ;;  %v1322_v55 = vld [vmem:[%s2773_s5] sm:$0xff] }
 0x394   : > { %v1483_v47 = vpop.permute.xlu0 %1482  ;;  %1475 = vmatprep.mubr.f32.mxu1 %v2304_v35 }
 0x395   : > { %1411 = vmatprep.subr.mxu1 %v1321_v48  ;;  %v1485_v54 = vpop.permute.xlu1 %1484 }
 0x396   : > { %v1486_v57 = vsel %vm575_vm4, %v1483_v47, %v1485_v54  ;;  %1412 = vmatpush1.msra.mxu1 %v1320_v52  ;;  %v1487_v58 = vsel %vm575_vm4, %v1485_v54, %v1483_v47 }
 0x397   : > { %v1489_v59 = vmul.f32 %v1486_v57, %v2483_v3  ;;  %v1488_v61 = vmul.f32 %v1487_v58, %v2480_v2 }
 0x398   : > { %v1569_v60 = vpop.permute.xlu0 %1568 }
 0x399   : > { %1495 = vmatprep.subr.mxu1 %v1489_v59  ;;  %v1571_v56 = vpop.permute.xlu1 %1570 }
 0x39a   : > { %v1572_v63 = vsel %vm679_vm5, %v1569_v60, %v1571_v56  ;;  %v1573_v3 = vsel %vm679_vm5, %v1571_v56, %v1569_v60 }
 0x39b   : > { %v1575_v0 = vmul.f32 %v1572_v63, %v2506_v13  ;;  %2206 = vmatmul.mubr.msk.f32.vlgmr.msra.gmra.mrb[0].mxu1 %vm1333_vm10, %v1322_v55  ;;  %v1574_v2 = vmul.f32 %v1573_v3, %v2503_v12  ;;  %v1654_v12 = vmul.f32 %v2637_v29, %v2534_v25  ;;  %v2211_v25 = vld [vmem:[%s2773_s5 + $0x20] sm:$0xff]  ;;  %v2217_v29 = vld [vmem:[%s2773_s5 + $0x38] sm:$0xff] }
 0x39c   : > { %1496 = vmatpush1.msra.mxu1 %v1488_v61  ;;  %1559 = vmatprep.mubr.f32.mxu1 %v2304_v35  ;;  %v1735_v13 = vpop.permute.xlu0 %1734 }
 0x39d   : > { %1581 = vmatprep.subr.mxu1 %v1575_v0  ;;  %v1737_v6 = vpop.permute.xlu1 %1736 }
 0x39e   : > { %v1739_v7 = vsel %vm880_vm6, %v1737_v6, %v1735_v13  ;;  %v1738_v45 = vsel %vm880_vm6, %v1735_v13, %v1737_v6 }
 0x39f   : > { %v1741_v9 = vmul.f32 %v1739_v7, %v2537_v27  ;;  %v1740_v27 = vmul.f32 %v1738_v45, %v2557_v34  ;;  %v2213_v34 = vld [vmem:[%s2773_s5 + $0x28] sm:$0xff] }
 0x3a0   : > { %v1821_v17 = vpop.permute.xlu0 %1820 }
 0x3a1   : > { %v1823_v10 = vpop.permute.xlu1 %1822 }
 0x3a2   : > { %v1825_v11 = vsel %vm984_vm7, %v1823_v10, %v1821_v17  ;;  %v1824_v18 = vsel %vm984_vm7, %v1821_v17, %v1823_v10 }
 0x3a3   : > { %2208 = vmatmul.mubr.msk.f32.vlgmr.msra.gmra.mrb[0].mxu1 %vm1333_vm10, %v2207_v4  ;;  %v1827_v14 = vmul.f32 %v1825_v11, %v2562_v38  ;;  %v1826_v38 = vmul.f32 %v1824_v18, %v2580_v50  ;;  %v2215_v50 = vld [vmem:[%s2773_s5 + $0x30] sm:$0xff] }
 0x3a4   : > { %1582 = vmatpush1.msra.mxu1 %v1574_v2  ;;  %1645 = vmatprep.mubr.f32.mxu1 %v2304_v35  ;;  %v1907_v15 = vpop.permute.xlu0 %1906 }
 0x3a5   : > { %1661 = vmatprep.subr.mxu1 %v1655_v5  ;;  %v1909_v16 = vpop.permute.xlu1 %1908 }
 0x3a6   : > { %v1911_v19 = vsel %vm1088_vm8, %v1909_v16, %v1907_v15  ;;  %v1910_v23 = vsel %vm1088_vm8, %v1907_v15, %v1909_v16 }
 0x3a7   : > { %v1913_v20 = vmul.f32 %v1911_v19, %v2585_v53  ;;  %v1912_v53 = vmul.f32 %v1910_v23, %v2603_v62  ;;  %v2219_v62 = vld [vmem:[%s2773_s5 + $0x40] sm:$0xff] }
 0x3a8   : > { %v1993_v21 = vpop.permute.xlu0 %1992 }
 0x3a9   : > { %v1995_v22 = vpop.permute.xlu1 %1994 }
 0x3aa   : > { %v1997_v24 = vsel %vm1192_vm9, %v1995_v22, %v1993_v21  ;;  %v1996_v28 = vsel %vm1192_vm9, %v1993_v21, %v1995_v22 }
 0x3ab   : > { %2210 = vmatmul.mubr.msk.f32.vlgmr.msra.gmra.mrb[0].mxu1 %vm1333_vm10, %v2209_v8  ;;  %v1999_v26 = vmul.f32 %v1997_v24, %v2608_v1  ;;  %v1998_v30 = vmul.f32 %v1996_v28, %v2622_v46 }
 0x3ac   : > { %1662 = vmatpush1.msra.mxu1 %v1654_v12  ;;  %1725 = vmatprep.mubr.f32.mxu1 %v2304_v35 }
 0x3ad   : > { %1747 = vmatprep.subr.mxu1 %v1741_v9 }
 0x3b3   : > { %2212 = vmatmul.mubr.msk.f32.vlgmr.msra.gmra.mrb[0].mxu1 %vm1333_vm10, %v2211_v25 }
 0x3b4   : > { %1748 = vmatpush1.msra.mxu1 %v1740_v27  ;;  %1811 = vmatprep.mubr.f32.mxu1 %v2304_v35 }
 0x3b5   : > { %1833 = vmatprep.subr.mxu1 %v1827_v14 }
 0x3b9   : > { %v2082_v42 = vpop.permute.xlu0 %2081 }
 0x3bb   : > { %2214 = vmatmul.mubr.msk.f32.vlgmr.msra.gmra.mrb[0].mxu1 %vm1333_vm10, %v2213_v34 }
 0x3bc   : > { %1834 = vmatpush1.msra.mxu1 %v1826_v38  ;;  %1897 = vmatprep.mubr.f32.mxu1 %v2304_v35 }
 0x3bd   : > { %1919 = vmatprep.subr.mxu1 %v1913_v20 }
 0x3c3   : > { %2216 = vmatmul.mubr.msk.f32.vlgmr.msra.gmra.mrb[0].mxu1 %vm1333_vm10, %v2215_v50 }
 0x3c4   : > { %1920 = vmatpush1.msra.mxu1 %v1912_v53  ;;  %1983 = vmatprep.mubr.f32.mxu1 %v2304_v35 }
 0x3c5   : > { %2005 = vmatprep.subr.mxu1 %v1999_v26 }
 0x3cb   : > { %2218 = vmatmul.mubr.msk.f32.vlgmr.msra.gmra.mrb[0].mxu1 %vm1333_vm10, %v2217_v29 }
 0x3cc   : > { %2006 = vmatpush1.msra.mxu1 %v1998_v30  ;;  %2069 = vmatprep.mubr.f32.mxu1 %v2304_v35 }
 0x3d3   : > { %2220 = vmatmul.mubr.msk.f32.vlgmr.msra.gmra.mrb[0].mxu1 %vm1333_vm10, %v2219_v62 }
 0x4a6   : > { %v2071_v1 = vpop.f32.mrb[0].mxu1 }
 0x4a7   : > { %v2084_v31 = vadd.f32 %v2082_v42, %v2071_v1  ;;  %v2073_v32 = vpop.f32.mrb[1].mxu1 }
 0x4a8   : > { %v2085_v33 = vadd.f32 %v2082_v42, %v2073_v32 }
 0x4a9   : > { %v2221_v36 = vmul.f32 -1.442695, %v2084_v31 }
 0x4aa   : > { %v2222_v37 = vmul.f32 -1.442695, %v2085_v33 }
 0x4ab   : > { %2288 = vpow2.f32 %v2221_v36 }
 0x4ac   : > { %2290 = vpow2.f32 %v2222_v37 }
 0x4b5   : > { %v2289_v46 = vpop.eup %2288 }
 0x4b6   : > { %v2291_v39 = vpop.eup %2290  ;;  %v2092_v40 = vadd.f32 1.0, %v2289_v46 }
 0x4b7   : > { %v2093_v35 = vadd.f32 1.0, %v2291_v39 }
 0x4b8   : > { %2292 = vrcp.f32 %v2092_v40 }
 0x4b9   : > { %2294 = vrcp.f32 %v2093_v35 }
 0x4c2   : > { %v2293_v41 = vpop.eup %2292 }
 0x4c3   : > { %v2295_v43 = vpop.eup %2294  ;;  %v2098_v44 = vmul.f32 %v2293_v41, %v2084_v31 }
 0x4c4   : > { %v2099_v49 = vmul.f32 %v2295_v43, %v2085_v33 }
 0x4c5   : > { %2100 = vst [vmem:[%s307_s19] sm:$0xff] %v2098_v44 }
 0x4c6   : > { %2101 = vst [vmem:[%s307_s19 + $0x8] sm:$0xff] %v2099_v49 }
 0x4c7 PF: > { %s18_s27 = sadd.s32 1, %s2302_s27  }
 0x4c8   : > { %p15_p4 = scmp.ge.s32.totalorder %s18_s27, 4  }
 0x4ca   :  { %17 = sbr.rel (!%p15_p4) target bundleno = 1 (0x1), region = 98 }

</bundles_post_ra>
